<compile_context>
chip_gen: v6e
topology: v6e:2x2x1
jax: 0.10.0
libtpu: 0.0.40
codegen_flags: <defaults>
</compile_context>

<pallas_src>
import functools

import numpy as np
import jax
import jax.numpy as jnp
from jax import lax
from jax.experimental import pallas as pl
from jax.experimental.pallas import tpu as pltpu


def _cdiv(a: int, b: int) -> int:
    return -(-a // b)


def _vmem_limit_bytes() -> int:
    """Scoped-VMEM limit derived from the chip, safe on v5e/v6e (128 MiB) and v7x (64 MiB)."""
    cap = None
    try:
        info = pltpu.get_tpu_info()
        cap = getattr(info, "vmem_capacity_bytes", None)
    except Exception:
        cap = None
    if not cap:
        cap = 64 << 20  # conservative fallback: v7x per-TensorCore VMEM
    return min(int(cap) * 5 // 8, 96 << 20)


def _pick_blocks(b: int, n: int, elem_budget: int):
    """Pick (tb, bn): batch block (divisor of b) and lane block (multiple of 128, or full n)."""
    if n <= elem_budget:
        bn = n                                   # full lane dim in one block (legal for any n)
        cap = max(1, elem_budget // max(bn, 1))
        tb = 1
        for d in range(1, b + 1):
            if b % d == 0 and d <= cap:
                tb = d
    else:
        bn = max(128, (elem_budget // 128) * 128)  # lane-dense interior blocks; tail is masked
        tb = 1
    # v7x megacore: prefer a >=2-long parallel grid (cheap on 1-TC chips: one extra ~0.35us step).
    if (b // tb) * _cdiv(n, bn) == 1:
        if bn % 256 == 0:
            bn //= 2
        elif tb % 2 == 0:
            tb //= 2
    return tb, bn


def _mipnerf_kernel(mean_ref, scale_ref, o_ref, *, in_dims, num_freqs, max_freq):
    c, f = in_dims, num_freqs
    tb, _, bn = mean_ref.shape

    # --- frequency weights: compile-time module constants, built in-register (no DMA) ---
    step = float(max_freq) / float(f - 1) if f > 1 else 0.0
    ln2 = float(np.log(2.0))
    freqs = lax.broadcasted_iota(jnp.int32, (1, f, 1), 1).astype(jnp.float32) * step
    mean_w = jnp.exp(freqs * ln2)                     # 2 ** freqs
    scale_w = -0.5 * jnp.exp(freqs * (2.0 * ln2))     # -(2 ** (2*freqs - 1))
    # Hoist the (TB, F, BN) weight broadcasts out of the channel loop (JAX does not CSE them).
    mw = jnp.broadcast_to(mean_w, (tb, f, bn))
    sw = jnp.broadcast_to(scale_w, (tb, f, bn))

    sin_slabs = []
    cos_slabs = []
    for x in range(c):                                # static unroll over input channels
        m_x = mean_ref[:, x, :].astype(jnp.float32)   # (TB, BN) row load from VMEM
        s_x = scale_ref[:, x, :].astype(jnp.float32)
        m_b = jnp.broadcast_to(m_x[:, None, :], (tb, f, bn))
        s_b = jnp.broadcast_to(s_x[:, None, :], (tb, f, bn))
        wm = m_b * mw                                 # (TB, F, BN)
        e = jnp.exp(s_b * sw)
        sin_slabs.append(jnp.sin(wm) * e)
        cos_slabs.append(jnp.cos(wm) * e)

    # Channel order: sin slabs (x*F + y) then cos slabs (C*F + x*F + y) -- matches reference.
    out = jnp.concatenate(sin_slabs + cos_slabs, axis=1)   # (TB, 2*C*F, BN)
    # Single full-tile store: unmasked, lane-dense on every interior block.
    o_ref[...] = out.astype(o_ref.dtype)


def mipnerf_positional_encode(mean, scale, num_freqs: int = 10, max_freq: float = 4.0):
    """Pallas implementation of MipNerfPositionalEncoder.forward(mean, scale)."""
    if mean.shape != scale.shape:
        raise ValueError(f"mean/scale shape mismatch: {mean.shape} vs {scale.shape}")
    if mean.ndim < 2:
        raise ValueError("expected input of shape (batch, in_dims, *spatial)")

    b, c = int(mean.shape[0]), int(mean.shape[1])
    spatial = tuple(mean.shape[2:])
    n = int(np.prod(spatial, dtype=np.int64)) if spatial else 1
    f = int(num_freqs)
    out_c = 2 * c * f

    m3 = mean.reshape(b, c, n)
    s3 = scale.reshape(b, c, n)

    itemsize = jnp.dtype(mean.dtype).itemsize
    vmem_limit = _vmem_limit_bytes()
    # Per (batch, lane) element: double-buffered in+out blocks + f32 in-kernel temporaries
    # (per-channel slabs, concatenated result, loop-local temps, broadcast weights).
    per_lane_vmem = 2 * (2 * c + out_c) * itemsize + 4 * (2 * out_c + 10 * f)
    elem_budget = max(128, (vmem_limit - (4 << 20)) // per_lane_vmem)

    tb, bn = _pick_blocks(b, n, elem_budget)
    grid = (b // tb, _cdiv(n, bn))

    kernel = functools.partial(
        _mipnerf_kernel, in_dims=c, num_freqs=f, max_freq=float(max_freq))

    out3 = pl.pallas_call(
        kernel,
        out_shape=jax.ShapeDtypeStruct((b, out_c, n), mean.dtype),
        grid_spec=pltpu.PrefetchScalarGridSpec(
            num_scalar_prefetch=0,
            grid=grid,
            in_specs=[
                pl.BlockSpec((tb, c, bn), lambda i, j: (i, 0, j)),   # mean
                pl.BlockSpec((tb, c, bn), lambda i, j: (i, 0, j)),   # scale
            ],
            out_specs=pl.BlockSpec((tb, out_c, bn), lambda i, j: (i, 0, j)),
        ),
        compiler_params=pltpu.CompilerParams(
            dimension_semantics=("parallel", "parallel"),
            vmem_limit_bytes=vmem_limit,
        ),
        cost_estimate=pl.CostEstimate(
            flops=4 * b * c * f * n,
            transcendentals=3 * b * c * f * n,
            bytes_accessed=(2 * c + out_c) * b * n * itemsize,
        ),
    )(m3, s3)

    return out3.reshape(b, out_c, *spatial)


def _reference(mean, scale, num_freqs, max_freq):
    """Pure-JAX reference matching the PyTorch module semantics."""
    freqs = np.linspace(0.0, float(max_freq), int(num_freqs), dtype=np.float32)
    mw = jnp.asarray((2.0 ** freqs).astype(np.float32))
    sw = jnp.asarray((-(2.0 ** (2.0 * freqs - 1.0))).astype(np.float32))
    b, c = mean.shape[:2]
    spatial = mean.shape[2:]
    wshape = (1, 1, num_freqs) + (1,) * len(spatial)
    wm = mean[:, :, None, ...] * mw.reshape(wshape)        # (B, C, F, *spatial)
    ws = scale[:, :, None, ...] * sw.reshape(wshape)
    wm = wm.reshape(b, c * num_freqs, *spatial)            # channel = x*F + y
    ws = ws.reshape(b, c * num_freqs, *spatial)
    e = jnp.exp(ws)
    return jnp.concatenate([jnp.sin(wm) * e, jnp.cos(wm) * e], axis=1)


if __name__ == "__main__":
    key = jax.random.PRNGKey(0)
    k1, k2, k3, k4 = jax.random.split(key, 4)

    # Matches MipNerfPositionalEncoder(in_dims=3, num_freqs=4): output_dim = 24.
    num_freqs, max_freq = 4, 4.0

    mean = jax.random.normal(k1, (2, 3, 16, 16), dtype=jnp.float32)
    scale = 0.01 * jax.random.normal(k2, (2, 3, 16, 16), dtype=jnp.float32)

    out = jax.block_until_ready(mipnerf_positional_encode(mean, scale, num_freqs, max_freq))
    ref = _reference(mean, scale, num_freqs, max_freq)
    assert out.shape == (2, 24, 16, 16), f"out.shape = {out.shape}"
    assert out.dtype == mean.dtype
    assert jnp.allclose(out, ref, rtol=1e-3, atol=1e-3), "mismatch vs reference"

    # Doctest-style shape check: (1, 3, 10, 10) -> (1, 24, 10, 10).
    mean2 = jax.random.normal(k3, (1, 3, 10, 10), dtype=jnp.float32)
    scale2 = 0.01 * jax.random.normal(k4, (1, 3, 10, 10), dtype=jnp.float32)
    out2 = jax.block_until_ready(
        mipnerf_positional_encode(mean2, scale2, num_freqs, max_freq))
    ref2 = _reference(mean2, scale2, num_freqs, max_freq)
    assert out2.shape == (1, 24, 10, 10), f"out2.shape = {out2.shape}"
    assert jnp.allclose(out2, ref2, rtol=1e-3, atol=1e-3), "mismatch vs reference (doctest shape)"

    print("KERNEL_OK")
</pallas_src>

<mosaic_0001>
module attributes {stable_mosaic.version = 11 : i64} {
  func.func @_mipnerf_kernel(%arg0: i32, %arg1: i32, %arg2: memref<2x3x128xf32, #tpu.memory_space<vmem>>, %arg3: memref<2x3x128xf32, #tpu.memory_space<vmem>>, %arg4: memref<2x24x128xf32, #tpu.memory_space<vmem>>) attributes {dimension_semantics = [#tpu.dimension_semantics<parallel>, #tpu.dimension_semantics<parallel>], iteration_bounds = array<i64: 1, 2>, scalar_prefetch = 0 : i64, scratch_operands = 0 : i64, tpu.core_type = #tpu.core_type<tc>, window_params = [{transform_indices = @transform_0, window_bounds = array<i64: 2, 3, 128>}, {transform_indices = @transform_1, window_bounds = array<i64: 2, 3, 128>}, {transform_indices = @transform_2, window_bounds = array<i64: 2, 24, 128>}]} {
    %0 = tpu.iota {dimensions = array<i32: 1>} : vector<1x4x1xi32>
    %1 = arith.sitofp %0 : vector<1x4x1xi32> to vector<1x4x1xf32>
    %cst = arith.constant 1.33333337 : f32
    %2 = vector.broadcast %cst : f32 to vector<1x4x1xf32>
    %3 = arith.mulf %1, %2 : vector<1x4x1xf32>
    %cst_0 = arith.constant 0.693147182 : f32
    %4 = vector.broadcast %cst_0 : f32 to vector<1x4x1xf32>
    %5 = arith.mulf %3, %4 : vector<1x4x1xf32>
    %6 = math.exp %5 : vector<1x4x1xf32>
    %cst_1 = arith.constant 1.38629436 : f32
    %7 = vector.broadcast %cst_1 : f32 to vector<1x4x1xf32>
    %8 = arith.mulf %3, %7 : vector<1x4x1xf32>
    %9 = math.exp %8 : vector<1x4x1xf32>
    %cst_2 = arith.constant -5.000000e-01 : f32
    %10 = vector.broadcast %cst_2 : f32 to vector<1x4x1xf32>
    %11 = arith.mulf %10, %9 : vector<1x4x1xf32>
    %12 = vector.shape_cast %6 : vector<1x4x1xf32> to vector<1x4x1xf32>
    %13 = vector.broadcast %12 : vector<1x4x1xf32> to vector<2x4x128xf32>
    %14 = vector.shape_cast %11 : vector<1x4x1xf32> to vector<1x4x1xf32>
    %15 = vector.broadcast %14 : vector<1x4x1xf32> to vector<2x4x128xf32>
    %c0 = arith.constant 0 : index
    %c0_3 = arith.constant 0 : index
    %c0_4 = arith.constant 0 : index
    %16 = vector.load %arg2[%c0, %c0_3, %c0_4] : memref<2x3x128xf32, #tpu.memory_space<vmem>>, vector<2x1x128xf32>
    %17 = vector.shape_cast %16 : vector<2x1x128xf32> to vector<2x128xf32>
    %c0_5 = arith.constant 0 : index
    %c0_6 = arith.constant 0 : index
    %c0_7 = arith.constant 0 : index
    %18 = vector.load %arg3[%c0_5, %c0_6, %c0_7] : memref<2x3x128xf32, #tpu.memory_space<vmem>>, vector<2x1x128xf32>
    %19 = vector.shape_cast %18 : vector<2x1x128xf32> to vector<2x128xf32>
    %20 = vector.shape_cast %17 : vector<2x128xf32> to vector<2x1x128xf32>
    %21 = vector.shape_cast %20 : vector<2x1x128xf32> to vector<2x1x128xf32>
    %22 = vector.broadcast %21 : vector<2x1x128xf32> to vector<2x4x128xf32>
    %23 = vector.shape_cast %19 : vector<2x128xf32> to vector<2x1x128xf32>
    %24 = vector.shape_cast %23 : vector<2x1x128xf32> to vector<2x1x128xf32>
    %25 = vector.broadcast %24 : vector<2x1x128xf32> to vector<2x4x128xf32>
    %26 = arith.mulf %22, %13 : vector<2x4x128xf32>
    %27 = arith.mulf %25, %15 : vector<2x4x128xf32>
    %28 = math.exp %27 : vector<2x4x128xf32>
    %29 = math.sin %26 : vector<2x4x128xf32>
    %30 = arith.mulf %29, %28 : vector<2x4x128xf32>
    %31 = math.cos %26 : vector<2x4x128xf32>
    %32 = arith.mulf %31, %28 : vector<2x4x128xf32>
    %c0_8 = arith.constant 0 : index
    %c1 = arith.constant 1 : index
    %c0_9 = arith.constant 0 : index
    %33 = vector.load %arg2[%c0_8, %c1, %c0_9] : memref<2x3x128xf32, #tpu.memory_space<vmem>>, vector<2x1x128xf32>
    %34 = vector.shape_cast %33 : vector<2x1x128xf32> to vector<2x128xf32>
    %c0_10 = arith.constant 0 : index
    %c1_11 = arith.constant 1 : index
    %c0_12 = arith.constant 0 : index
    %35 = vector.load %arg3[%c0_10, %c1_11, %c0_12] : memref<2x3x128xf32, #tpu.memory_space<vmem>>, vector<2x1x128xf32>
    %36 = vector.shape_cast %35 : vector<2x1x128xf32> to vector<2x128xf32>
    %37 = vector.shape_cast %34 : vector<2x128xf32> to vector<2x1x128xf32>
    %38 = vector.shape_cast %37 : vector<2x1x128xf32> to vector<2x1x128xf32>
    %39 = vector.broadcast %38 : vector<2x1x128xf32> to vector<2x4x128xf32>
    %40 = vector.shape_cast %36 : vector<2x128xf32> to vector<2x1x128xf32>
    %41 = vector.shape_cast %40 : vector<2x1x128xf32> to vector<2x1x128xf32>
    %42 = vector.broadcast %41 : vector<2x1x128xf32> to vector<2x4x128xf32>
    %43 = arith.mulf %39, %13 : vector<2x4x128xf32>
    %44 = arith.mulf %42, %15 : vector<2x4x128xf32>
    %45 = math.exp %44 : vector<2x4x128xf32>
    %46 = math.sin %43 : vector<2x4x128xf32>
    %47 = arith.mulf %46, %45 : vector<2x4x128xf32>
    %48 = math.cos %43 : vector<2x4x128xf32>
    %49 = arith.mulf %48, %45 : vector<2x4x128xf32>
    %c0_13 = arith.constant 0 : index
    %c2 = arith.constant 2 : index
    %c0_14 = arith.constant 0 : index
    %50 = vector.load %arg2[%c0_13, %c2, %c0_14] : memref<2x3x128xf32, #tpu.memory_space<vmem>>, vector<2x1x128xf32>
    %51 = vector.shape_cast %50 : vector<2x1x128xf32> to vector<2x128xf32>
    %c0_15 = arith.constant 0 : index
    %c2_16 = arith.constant 2 : index
    %c0_17 = arith.constant 0 : index
    %52 = vector.load %arg3[%c0_15, %c2_16, %c0_17] : memref<2x3x128xf32, #tpu.memory_space<vmem>>, vector<2x1x128xf32>
    %53 = vector.shape_cast %52 : vector<2x1x128xf32> to vector<2x128xf32>
    %54 = vector.shape_cast %51 : vector<2x128xf32> to vector<2x1x128xf32>
    %55 = vector.shape_cast %54 : vector<2x1x128xf32> to vector<2x1x128xf32>
    %56 = vector.broadcast %55 : vector<2x1x128xf32> to vector<2x4x128xf32>
    %57 = vector.shape_cast %53 : vector<2x128xf32> to vector<2x1x128xf32>
    %58 = vector.shape_cast %57 : vector<2x1x128xf32> to vector<2x1x128xf32>
    %59 = vector.broadcast %58 : vector<2x1x128xf32> to vector<2x4x128xf32>
    %60 = arith.mulf %56, %13 : vector<2x4x128xf32>
    %61 = arith.mulf %59, %15 : vector<2x4x128xf32>
    %62 = math.exp %61 : vector<2x4x128xf32>
    %63 = math.sin %60 : vector<2x4x128xf32>
    %64 = arith.mulf %63, %62 : vector<2x4x128xf32>
    %65 = math.cos %60 : vector<2x4x128xf32>
    %66 = arith.mulf %65, %62 : vector<2x4x128xf32>
    %67 = tpu.concatenate %30, %47, %64, %32, %49, %66 in 1 : vector<2x4x128xf32>, vector<2x4x128xf32>, vector<2x4x128xf32>, vector<2x4x128xf32>, vector<2x4x128xf32>, vector<2x4x128xf32> -> vector<2x24x128xf32>
    %c0_18 = arith.constant 0 : index
    %c0_19 = arith.constant 0 : index
    %c0_20 = arith.constant 0 : index
    %68 = vector.load %arg4[%c0_18, %c0_19, %c0_20] : memref<2x24x128xf32, #tpu.memory_space<vmem>>, vector<2x24x128xf32>
    tpu.vector_store %arg4[%c0_18, %c0_19, %c0_20], %67 {strides = array<i32>} : memref<2x24x128xf32, #tpu.memory_space<vmem>>, vector<2x24x128xf32>,
    return
  }
  func.func @transform_0(%arg0: i32, %arg1: i32) -> (i32, i32, i32) {
    %c0_i32 = arith.constant 0 : i32
    %c0_i32_0 = arith.constant 0 : i32
    return %arg0, %c0_i32, %arg1 : i32, i32, i32
  }
  func.func @transform_1(%arg0: i32, %arg1: i32) -> (i32, i32, i32) {
    %c0_i32 = arith.constant 0 : i32
    %c0_i32_0 = arith.constant 0 : i32
    return %arg0, %c0_i32, %arg1 : i32, i32, i32
  }
  func.func @transform_2(%arg0: i32, %arg1: i32) -> (i32, i32, i32) {
    %c0_i32 = arith.constant 0 : i32
    %c0_i32_0 = arith.constant 0 : i32
    return %arg0, %c0_i32, %arg1 : i32, i32, i32
  }
}

</mosaic_0001>

<bundles_post_ra>
// kernel: tpu_custom_call.1
= control target key start
LH: loop header
LB: loop body
LE: loop exit
PB: predicated region body
PF: predicated region fallthrough
CT: control target
= control target key end

     0   :  { %7 = vsyncpa [#allocation5], 0  ;;  %s2826_s0 = inlined_call_operand.vmem [shape: f32[2,3,256], index: 0, kind: input, shape index: {}]   ;;  %s2827_s1 = inlined_call_operand.vmem [shape: f32[2,3,256], index: 1, kind: input, shape index: {}]   ;;  %s2828_s2 = inlined_call_operand.hbm [shape: f32[2,24,256], index: 2, kind: output, shape index: {}]  }
   0x1   :  { %9 = vsyncpa [#allocation5 + $0x1], 0  ;;  %s2085_s9 = smov 0   ;;  %s2087_s10 = smov 0  }
   0x2   :  { %s2089_s11 = smov 0   ;;  %s2091_s12 = smov 0  }
   0x3   :  { %s2093_s13 = smov 0   ;;  %s2095_s14 = smov 0  }
   0x4 LB: > { %s1779_s15 = sadd.s32 4294967295, %s2058_s14   ;;  %s1780_s16 = sadd.s32 4294967294, %s2058_s14   ;;  %s2058_s14 = sphi %s2095_s14, %s15_s14   ;;  %s2054_s13 = sphi %s2093_s13, %s2846_s13   ;;  %s2050_s12 = sphi %s2091_s12, %s2845_s12   ;;  %s2046_s11 = sphi %s2089_s11, %s2844_s11   ;;  %s2042_s10 = sphi %s2087_s10, %s2843_s10   ;;  %s2038_s9 = sphi %s2085_s9, %s2842_s9  }
   0x5   : > { %s24_s17 = sadd.s32 1, %s2054_s13  ;;  %s36_s18 = sadd.s32 1, %s2046_s11 }
   0x6   : > { %p25_p0 = scmp.ge.s32.totalorder %s24_s17, 2  ;;  %p43_p1 = scmp.ne.s32.totalorder %s2046_s11, %s2042_s10 }
   0x7   : > { %p44_p2 = scmp.eq.s32.totalorder %s2058_s14, 0  ;;  %p103_p3 = scmp.eq.s32.totalorder %s1779_s15, 1 }
   0x8   : > { %s2848_s17 = smov (%p25_p0, %s24_s17), 0  ;;  %p108_p6 = scmp.ne.s32.totalorder %s2042_s10, %s2038_s9 }
   0x9   : > { %p2124_p4 = por %p44_p2, %p43_p1  ;;  %p2128_p5 = por %p103_p3, %p43_p1 }
   0xa   : > { %s32_s21 = ssub.s32 %s2054_s13, %s2848_s17  ;;  %p109_p8 = scmp.eq.s32.totalorder %s1780_s16, 1 }
   0xb   : > { %p34_p7 = scmp.eq.s32.totalorder %s32_s21, 0  ;;  %p1782_p10 = scmp.ge.s32.totalorder %s2058_s14, 2 }
   0xc   : > { %p2139_p9 = por %p109_p8, %p108_p6 }
   0xd   : > { %s2137_s22 = scalar_select %p34_p7, %s2046_s11, %s36_s18  }
   0xe   : > { %125 = sbr.rel (%p1782_p10) target bundleno = 29 (0x1d), region = 16 }
  0x13   : > { %128 = sbr.rel (!%p2124_p4) target bundleno = 24 (0x18), region = 20  ;;  %s130_s24 = sand.u32 (%p2124_p4), 1, %s2046_s11  }
  0x14   : > { %s1784_s25 = sshll.u32 (%p2124_p4), %s2054_s13, 2  ;;  %s1783_s26 = sshll.u32 (%p2124_p4), %s130_s24, 3 }
  0x15   : > { %s137_s29 = scalar_lea.vmem (%p2124_p4), %s2826_s0, %s1784_s25  ;;  %s132_s30 = scalar_lea.vmem (%p2124_p4), [#allocation2], %s1783_s26 }
  0x16   : > { %v154_v0 = vld [vmem:[%s137_s29] sm:$0xf] (%p2124_p4)  ;;  %v156_v1 = vld [vmem:[%s137_s29 + $0x8] sm:$0xf] (%p2124_p4) }
  0x17   : > { %155 = vst [vmem:[%s132_s30] sm:$0xf] (%p2124_p4), %v154_v0  ;;  %157 = vst [vmem:[%s132_s30 + $0x4] sm:$0xf] (%p2124_p4), %v156_v1 }
  0x18 PF: > { %185 = sbr.rel (!%p2124_p4) target bundleno = 29 (0x1d), region = 61  ;;  %s187_s3 = sand.u32 (%p2124_p4), 1, %s2046_s11  }
  0x19   : > { %s1786_s4 = sshll.u32 (%p2124_p4), %s2054_s13, 2  ;;  %s1785_s5 = sshll.u32 (%p2124_p4), %s187_s3, 3 }
  0x1a   : > { %s194_s8 = scalar_lea.vmem (%p2124_p4), %s2827_s1, %s1786_s4  ;;  %s189_s15 = scalar_lea.vmem (%p2124_p4), [#allocation3], %s1785_s5 }
  0x1b   : > { %v211_v2 = vld [vmem:[%s194_s8] sm:$0xf] (%p2124_p4)  ;;  %v213_v3 = vld [vmem:[%s194_s8 + $0x8] sm:$0xf] (%p2124_p4) }
  0x1c   : > { %212 = vst [vmem:[%s189_s15] sm:$0xf] (%p2124_p4), %v211_v2  ;;  %214 = vst [vmem:[%s189_s15 + $0x4] sm:$0xf] (%p2124_p4), %v213_v3 }
  0x1d PF: > { %p1787_p11 = scmp.ge.s32.totalorder %s2058_s14, 1  ;;  %p241_p12 = scmp.lt.s32.totalorder %s2058_s14, 3 }
  0x1f   : > { %p242_p13 = pnand %p1787_p11, %p241_p12 }
  0x20   : > { %s2163_s16 = sand.u32 (!%p242_p13), 1, %s2042_s10   ;;  %s1850_s26 = sshll.u32 (!%p242_p13), %s2050_s12, 7 }
  0x21   : > { %245 = sbr.rel (%p242_p13) target bundleno = 284 (0x11c), region = 102  ;;  %s1788_s18 = sshll.u32 (!%p242_p13), %s2163_s16, 3 }
  0x22   : > { %s2168_s19 = scalar_lea.vmem (!%p242_p13), [#allocation2], %s1788_s18  ;;  %s2277_s21 = scalar_lea.vmem (!%p242_p13), [#allocation3], %s1788_s18 }
  0x23   : > { %s1853_s24 = smul.u32 (!%p242_p13), 48, %s2163_s16  ;;  %s2771_s30 = scalar_lea.hbm (!%p242_p13), %s2828_s2, %s1850_s26 }
  0x24   : > { %s1664_s12 = scalar_lea.sflag (!%p242_p13), [#allocation5], %s2163_s16  ;;  %s2066_s4 = smov (!%p242_p13), [#allocation4]  }
  0x25   : > { %s2685_s25 = scalar_lea.vmem (!%p242_p13), [#allocation4], %s1853_s24  ;;  %s1986_s5 = sshll.u32 (!%p242_p13), %s2066_s4, 4  ;;  %s1987_s5 = int_to_ptr.vmem [resolvable:$false] %s1986_s5 }
  0x26   : > { %v283_v4 = vlaneseq  ;;  %v1790_v10 = vld [vmem:[%s2168_s19] ss:$0 sm:$0xff]  ;;  %v1791_v11 = vld [vmem:[%s2168_s19 + $0x4] ss:$0 sm:$0xff]  ;;  %v1831_v12 = vld [vmem:[%s2168_s19 + $0x6] ss:$0 sm:$0xff] }
  0x27   : > { %v1810_v22 = vld [vmem:[%s2168_s19 + $0x1] ss:$0 sm:$0xff]  ;;  %v2060_v43 = vmov 683565275   ;;  %v2061_v45 = vmov 2475754826  }
  0x28   : > { %v284_v5 = vshrl.u32 %v283_v4, 7  ;;  %v2062_v47 = vmov 2131351028   ;;  %v2063_v49 = vmov 2102212464   ;;  %s1679_s27 = sshll.u32 %s2685_s25, 4  ;;  %s2774_s27 = int_to_ptr.vmem [resolvable:$true] %s1679_s27 }
  0x29   : > { %v2064_v51 = vmov 920167782   ;;  %v2065_v59 = vmov 1326507024   ;;  %s1982_s3 = scalar_lea.vmem %s2774_s27, 768  ;;  %s1988_s6 = scalar_lea.vmem %s1987_s5, 1536 }
  0x2a   : > { %v285_v6 = vcvt.s32.f32 %v284_v5  ;;  %p1983_p0 = scmp.ne.s32.totalorder %s2774_s27, %s1982_s3  ;;  %p1989_p3 = scmp.lt.s32.totalorder %s2774_s27, %s1987_s5 }
  0x2b   : > { %p1990_p4 = scmp.lt.s32.totalorder %s1988_s6, %s1982_s3 }
  0x2c   : > { %v286_v7 = vmul.f32 1.3333334, %v285_v6  ;;  %p1984_p1 = pnand %p1983_p0, %p2128_p5 }
  0x2d   : > { %p1991_p6 = por %p1990_p4, %p1989_p3 }
  0x2e   : > { %v287_v8 = vmul.f32 0.6931472, %v286_v7  ;;  %v290_v23 = vmul.f32 1.3862944, %v286_v7  ;;  %p1985_p2 = pneg %p1984_p1 }
  0x30   : > { %v288_v9 = vmul.f32 1.442695, %v287_v8  ;;  %v291_v31 = vmul.f32 1.442695, %v290_v23  ;;  %p1992_p7 = pnand %p1991_p6, %p1985_p2 }
  0x32   : > { %1942 = vpow2.f32 %v288_v9 }
  0x33   : > { %1944 = vpow2.f32 %v291_v31 }
  0x3f   : > { %v2173_v13 = vpop.eup %1942 }
  0x40   : > { %v2176_v14 = vmul.f32 %v2173_v13, %v1790_v10  ;;  %v2179_v15 = vmul.f32 %v2173_v13, %v1791_v11  ;;  %v2182_v16 = vmul.f32 %v2173_v13, %v1831_v12  ;;  %v2194_v28 = vmul.f32 %v2173_v13, %v1810_v22 }
  0x42   : > { %v322_v17 = vand.u32 2147483647, %v2176_v14  ;;  %v325_v18 = vand.u32 2139095040, %v2176_v14  ;;  %v426_v19 = vand.u32 2147483647, %v2179_v15  ;;  %v429_v21 = vand.u32 2139095040, %v2179_v15 }
  0x43   : > { %v771_v36 = vand.u32 2139095040, %v2194_v28  ;;  %vm324_vm13 = vcmp.lt.s32.totalorder %v2176_v14, 0 }
  0x44   : > { %v326_v20 = vshrl.u32 %v325_v18, 23  ;;  %v329_v24 = vand.u32 8388607, %v322_v17  ;;  %v430_v26 = vshrl.u32 %v429_v21, 23  ;;  %v433_v27 = vand.u32 8388607, %v426_v19 }
  0x45   : > { %v772_v53 = vshrl.u32 %v771_v36, 23 }
  0x46   : > { %v1794_v25 = vadd.s32 4294967169, %v326_v20  ;;  %v1798_v30 = vadd.s32 4294967169, %v430_v26  ;;  %v330_v32 = vor.u32 8388608, %v329_v24  ;;  %v434_v33 = vor.u32 8388608, %v433_v27 }
  0x48   : > { %v332_v29 = vadd.s32 1, %v1794_v25  ;;  %v436_v34 = vadd.s32 1, %v1798_v30  ;;  %v2197_v39 = vshll.u32 %v330_v32, 8  ;;  %v2199_v41 = vshll.u32 %v434_v33, 8 }
  0x4a   : > { %vm333_vm0 = vcmp.gt.s32.totalorder %v332_v29, 0  ;;  %vm437_vm1 = vcmp.gt.s32.totalorder %v436_v34, 0 }
  0x4b   : > { %v334_v35 = vsel %vm333_vm0, %v332_v29, 0  ;;  %v438_v40 = vsel %vm437_vm1, %v436_v34, 0  ;;  %vm2314_vm1 = vcmp.le.f32.partialorder %v322_v17, 0.7853982 }
  0x4c   : > { %v335_v37 = vshrl.u32 %v334_v35, 5  ;;  %v336_v38 = vand.u32 31, %v334_v35  ;;  %v439_v2 = vshrl.u32 %v438_v40, 5  ;;  %v440_v3 = vand.u32 31, %v438_v40  ;;  %v1945_v35 = vpop.eup %1944 }
  0x4e   : > { %v337_v42 = vsub.s32 32, %v336_v38  ;;  %v339_v44 = vshll.u32 %v2060_v43, %v336_v38  ;;  %v342_v46 = vshll.u32 %v2061_v45, %v336_v38  ;;  %v345_v48 = vshll.u32 %v2062_v47, %v336_v38 }
  0x4f   : > { %v348_v50 = vshll.u32 %v2063_v49, %v336_v38  ;;  %v351_v52 = vshll.u32 %v2064_v51, %v336_v38  ;;  %vm354_vm2 = vcmp.lt.s32.totalorder %v335_v37, 1  ;;  %vm355_vm3 = vcmp.lt.s32.totalorder %v335_v37, 2 }
  0x50   : > { %v338_v54 = vshrl.u32 %v2060_v43, %v337_v42  ;;  %v340_v55 = vshrl.u32 %v2061_v45, %v337_v42  ;;  %v343_v56 = vshrl.u32 %v2062_v47, %v337_v42  ;;  %v346_v57 = vshrl.u32 %v2063_v49, %v337_v42 }
  0x51   : > { %v349_v58 = vshrl.u32 %v2064_v51, %v337_v42  ;;  %v352_v60 = vshrl.u32 %v2065_v59, %v337_v42  ;;  %vm356_vm4 = vcmp.lt.s32.totalorder %v335_v37, 3  ;;  %vm357_vm5 = vcmp.lt.s32.totalorder %v335_v37, 4 }
  0x52   : > { %v341_v61 = vor.u32 %v340_v55, %v339_v44  ;;  %v344_v62 = vor.u32 %v343_v56, %v342_v46  ;;  %v347_v63 = vor.u32 %v346_v57, %v345_v48  ;;  %v441_v11 = vsub.s32 32, %v440_v3 }
  0x53   : > { %v350_v0 = vor.u32 %v349_v58, %v348_v50  ;;  %v353_v1 = vor.u32 %v352_v60, %v351_v52  ;;  %v443_v21 = vshll.u32 %v2060_v43, %v440_v3  ;;  %v446_v32 = vshll.u32 %v2061_v45, %v440_v3 }
  0x54   : > { %v358_v4 = vsel %vm354_vm2, %v338_v54, %v341_v61  ;;  %v359_v5 = vsel %vm357_vm5, %v347_v63, 2102212464  ;;  %v362_v6 = vsel %vm354_vm2, %v341_v61, %v344_v62  ;;  %v366_v7 = vsel %vm354_vm2, %v344_v62, %v347_v63 }
  0x55   : > { %v360_v8 = vsel %vm356_vm4, %v344_v62, %v359_v5  ;;  %v363_v9 = vsel %vm357_vm5, %v350_v0, 920167782  ;;  %v367_v10 = vsel %vm357_vm5, %v353_v1, 1326507024  ;;  %v442_v25 = vshrl.u32 %v2060_v43, %v441_v11 }
  0x56   : > { %v361_v12 = vsel %vm355_vm3, %v358_v4, %v360_v8  ;;  %v364_v18 = vsel %vm356_vm4, %v347_v63, %v363_v9  ;;  %v368_v20 = vsel %vm356_vm4, %v350_v0, %v367_v10  ;;  %v444_v31 = vshrl.u32 %v2061_v45, %v441_v11 }
  0x57   : > { %v365_v22 = vsel %vm355_vm3, %v362_v6, %v364_v18  ;;  %v369_v23 = vsel %vm355_vm3, %v366_v7, %v368_v20  ;;  %v377_v24 = vmul.u32 %v2197_v39, %v361_v12  ;;  %v447_v33 = vshrl.u32 %v2062_v47, %v441_v11 }
  0x58   : > { %v2225_v26 = vmul.u32.u64.low %v2197_v39, %v369_v23  ;;  %v2226_v27 = vmul.u32.u64.high %v2197_v39, %v369_v23, %v2225_v26  ;;  %v2229_v29 = vmul.u32.u64.low %v2197_v39, %v365_v22  ;;  %v2230_v30 = vmul.u32.u64.high %v2197_v39, %v365_v22, %v2229_v29 }
  0x59   : > { %v449_v34 = vshll.u32 %v2062_v47, %v440_v3  ;;  %v450_v36 = vshrl.u32 %v2063_v49, %v441_v11  ;;  %v452_v37 = vshll.u32 %v2063_v49, %v440_v3  ;;  %v453_v38 = vshrl.u32 %v2064_v51, %v441_v11 }
  0x5a   : > { %v455_v40 = vshll.u32 %v2064_v51, %v440_v3  ;;  %v445_v39 = vor.u32 %v444_v31, %v443_v21  ;;  %v448_v42 = vor.u32 %v447_v33, %v446_v32  ;;  %v456_v44 = vshrl.u32 %v2065_v59, %v441_v11 }
  0x5b   : > { %vm458_vm6 = vcmp.lt.s32.totalorder %v439_v2, 1  ;;  %vm379_vm7 = vc.u32 %v2226_v27, %v2229_v29  ;;  %v380_v46 = vadd.s32 1, %v2230_v30  ;;  %v451_v48 = vor.u32 %v450_v36, %v449_v34 }
  0x5c   : > { %v1814_v50 = vadd.s32 4294967169, %v772_v53  ;;  %v454_v52 = vor.u32 %v453_v38, %v452_v37  ;;  %v457_v54 = vor.u32 %v456_v44, %v455_v40  ;;  %vm459_vm8 = vcmp.lt.s32.totalorder %v439_v2, 2 }
  0x5d   : > { %vm460_vm9 = vcmp.lt.s32.totalorder %v439_v2, 3  ;;  %v381_v55 = vsel %vm379_vm7, %v380_v46, %v2230_v30  ;;  %vm461_vm10 = vcmp.lt.s32.totalorder %v439_v2, 4  ;;  %v462_v56 = vsel %vm458_vm6, %v442_v25, %v445_v39  ;;  %v1811_v30 = vld [vmem:[%s2168_s19 + $0x5] ss:$0 sm:$0xff] }
  0x5e   : > { %v466_v57 = vsel %vm458_vm6, %v445_v39, %v448_v42  ;;  %v382_v58 = vadd.s32 %v381_v55, %v377_v24  ;;  %v463_v60 = vsel %vm461_vm10, %v451_v48, 2102212464  ;;  %v467_v61 = vsel %vm461_vm10, %v454_v52, 920167782 }
  0x5f   : > { %v470_v62 = vsel %vm458_vm6, %v448_v42, %v451_v48  ;;  %v464_v63 = vsel %vm460_vm9, %v448_v42, %v463_v60  ;;  %v468_v0 = vsel %vm460_vm9, %v451_v48, %v467_v61  ;;  %v471_v1 = vsel %vm461_vm10, %v457_v54, 1326507024 }
  0x60   : > { %v778_v53 = vadd.s32 1, %v1814_v50  ;;  %v383_v3 = vadd.s32 536870912, %v382_v58  ;;  %v469_v4 = vsel %vm459_vm8, %v466_v57, %v468_v0  ;;  %v472_v5 = vsel %vm460_vm9, %v454_v52, %v471_v1 }
  0x61   : > { %v768_v6 = vand.u32 2147483647, %v2194_v28  ;;  %v465_v7 = vsel %vm459_vm8, %v462_v56, %v464_v63  ;;  %v473_v8 = vsel %vm459_vm8, %v470_v62, %v472_v5  ;;  %v2273_v31 = vmul.f32 -0.5, %v1945_v35 }
  0x62   : > { %v2254_v9 = vmul.u32.u64.low %v2199_v41, %v469_v4  ;;  %v2255_v10 = vmul.u32.u64.high %v2199_v41, %v469_v4, %v2254_v9  ;;  %v2258_v11 = vshrl.u32 %v383_v3, 30  ;;  %vm779_vm11 = vcmp.gt.s32.totalorder %v778_v53, 0 }
  0x63   : > { %v2261_v12 = vmul.u32.u64.low %v2199_v41, %v473_v8  ;;  %v2262_v18 = vmul.u32.u64.high %v2199_v41, %v473_v8, %v2261_v12  ;;  %v780_v20 = vsel %vm779_vm11, %v778_v53, 0  ;;  %v481_v22 = vmul.u32 %v2199_v41, %v465_v7  ;;  %v1792_v41 = vld [vmem:[%s2277_s21] ss:$0 sm:$0xff] }
  0x64   : > { %v385_v21 = vshll.u32 %v2258_v11, 30  ;;  %v484_v2 = vadd.s32 1, %v2255_v10  ;;  %v775_v23 = vand.u32 8388607, %v768_v6  ;;  %v782_v25 = vand.u32 31, %v780_v20 }
  0x65   : > { %vm483_vm12 = vc.u32 %v2262_v18, %v2254_v9  ;;  %v2281_v38 = vmul.f32 %v2173_v13, %v1811_v30  ;;  %v2284_v39 = vmul.f32 %v1792_v41, %v2273_v31  ;;  %v378_v35 = vadd.s32 %v2229_v29, %v2226_v27 }
  0x66   : > { %v386_v24 = vsub.s32 %v382_v58, %v385_v21  ;;  %v485_v26 = vsel %vm483_vm12, %v484_v2, %v2255_v10  ;;  %v776_v34 = vor.u32 8388608, %v775_v23  ;;  %v783_v40 = vsub.s32 32, %v782_v25 }
  0x67   : > { %v486_v33 = vadd.s32 %v485_v26, %v481_v22  ;;  %v408_v44 = vsub.s32 4, %v2258_v11  ;;  %v781_v48 = vshrl.u32 %v780_v20, 5  ;;  %v791_v54 = vshll.u32 %v2062_v47, %v782_v25 }
  0x68   : > { %v388_v32 = vsub.s32 0, %v386_v24  ;;  %v2292_v50 = vshll.u32 %v776_v34, 8  ;;  %v792_v55 = vshrl.u32 %v2063_v49, %v783_v40  ;;  %v875_v56 = vand.u32 2139095040, %v2281_v38 }
  0x69   : > { %v487_v37 = vadd.s32 536870912, %v486_v33  ;;  %v785_v27 = vshll.u32 %v2060_v43, %v782_v25  ;;  %v786_v29 = vshrl.u32 %v2061_v45, %v783_v40  ;;  %v788_v58 = vshll.u32 %v2061_v45, %v782_v25 }
  0x6a   : > { %v1795_v36 = vmin.u32 %v388_v32, %v386_v24  ;;  %v789_v60 = vshrl.u32 %v2062_v47, %v783_v40  ;;  %v794_v61 = vshll.u32 %v2063_v49, %v782_v25  ;;  %v795_v62 = vshrl.u32 %v2064_v51, %v783_v40 }
  0x6b   : > { %v2290_v46 = vshrl.u32 %v487_v37, 30  ;;  %v797_v1 = vshll.u32 %v2064_v51, %v782_v25  ;;  %v798_v53 = vshrl.u32 %v2065_v59, %v783_v40  ;;  %v793_v7 = vor.u32 %v792_v55, %v791_v54 }
  0x6c   : > { %v390_v42 = vclz %v1795_v36  ;;  %v784_v10 = vshrl.u32 %v2060_v43, %v783_v40  ;;  %v787_v12 = vor.u32 %v786_v29, %v785_v27  ;;  %vm803_vm15 = vcmp.lt.s32.totalorder %v781_v48, 4 }
  0x6d   : > { %v489_v57 = vshll.u32 %v2290_v46, 30  ;;  %v790_v22 = vor.u32 %v789_v60, %v788_v58  ;;  %v805_v2 = vsel %vm803_vm15, %v793_v7, 2102212464  ;;  %v796_v25 = vor.u32 %v795_v62, %v794_v61 }
  0x6e   : > { %v1796_v52 = vadd.s32 4294967294, %v390_v42  ;;  %v799_v26 = vor.u32 %v798_v53, %v797_v1  ;;  %vm800_vm0 = vcmp.lt.s32.totalorder %v781_v48, 1  ;;  %vm802_vm2 = vcmp.lt.s32.totalorder %v781_v48, 3 }
  0x6f   : > { %v2304_v0 = vsub.s32 %v486_v33, %v489_v57  ;;  %v409_v33 = vsel %vm324_vm13, %v408_v44, %v2258_v11  ;;  %v482_v41 = vadd.s32 %v2254_v9, %v2262_v18  ;;  %v804_v36 = vsel %vm800_vm0, %v784_v10, %v787_v12 }
  0x70   : > { %vm1797_vm14 = vcmp.lt.s32.totalorder %v1796_v52, 0  ;;  %v806_v37 = vsel %vm802_vm2, %v790_v22, %v805_v2  ;;  %vm801_vm3 = vcmp.lt.s32.totalorder %v781_v48, 2  ;;  %v812_v54 = vsel %vm800_vm0, %v790_v22, %v793_v7 }
  0x71   : > { %v393_v63 = vsel %vm1797_vm14, 0, %v1796_v52  ;;  %v492_v8 = vsub.s32 0, %v2304_v0  ;;  %v809_v52 = vsel %vm803_vm15, %v796_v25, 920167782  ;;  %v813_v11 = vsel %vm803_vm15, %v799_v26, 1326507024 }
  0x72   : > { %v394_v3 = vsub.s32 32, %v393_v63  ;;  %v395_v4 = vshll.u32 %v386_v24, %v393_v63  ;;  %v398_v5 = vsub.s32 4294967266, %v393_v63  ;;  %v807_v55 = vsel %vm801_vm3, %v804_v36, %v806_v37 }
  0x73   : > { %v1799_v23 = vmin.u32 %v492_v8, %v2304_v0  ;;  %v810_v9 = vsel %vm802_vm2, %v793_v7, %v809_v52  ;;  %v814_v18 = vsel %vm802_vm2, %v796_v25, %v813_v11  ;;  %v876_v29 = vshrl.u32 %v875_v56, 23 }
  0x74   : > { %v396_v20 = vshrl.u32 %v378_v35, %v394_v3  ;;  %v399_v21 = vadd.s32 127, %v398_v5  ;;  %v808_v35 = vsel %vm800_vm0, %v787_v12, %v790_v22  ;;  %v815_v27 = vsel %vm801_vm3, %v812_v54, %v814_v18 }
  0x75   : > { %v494_v34 = vclz %v1799_v23  ;;  %v811_v57 = vsel %vm801_vm3, %v808_v35, %v810_v9  ;;  %v2332_v61 = vmul.u32.u64.low %v2292_v50, %v815_v27  ;;  %v2333_v62 = vmul.u32.u64.high %v2292_v50, %v815_v27, %v2332_v61 }
  0x76   : > { %v397_v30 = vor.u32 %v396_v20, %v395_v4  ;;  %v400_v32 = vshll.u32 %v399_v21, 23  ;;  %v1818_v3 = vadd.s32 4294967169, %v876_v29  ;;  %v318_v4 = vmul.f32 1.442695, %v2284_v39 }
  0x77   : > { %v1800_v42 = vadd.s32 4294967294, %v494_v34  ;;  %v2338_v48 = vmul.u32.u64.low %v2292_v50, %v811_v57  ;;  %v2339_v7 = vmul.u32.u64.high %v2292_v50, %v811_v57, %v2338_v48  ;;  %v411_v56 = vsel %vm2314_vm1, 0, %v409_v33 }
  0x78   : > { %v401_v40 = vor.u32 4788187, %v400_v32  ;;  %v404_v17 = vcvt.s32.f32 %v397_v30  ;;  %v882_v12 = vadd.s32 1, %v1818_v3  ;;  %v872_v39 = vand.u32 2147483647, %v2281_v38 }
  0x79   : > { %vm1801_vm4 = vcmp.lt.s32.totalorder %v1800_v42, 0  ;;  %vm825_vm5 = vc.u32 %v2333_v62, %v2338_v48  ;;  %v415_v23 = vadd.s32 3, %v411_v56  ;;  %v826_v25 = vadd.s32 1, %v2339_v7 }
  0x7a   : > { %v402_v44 = vand.u32 2147483647, %v401_v40  ;;  %v497_v60 = vsel %vm1801_vm4, 0, %v1800_v42  ;;  %vm883_vm6 = vcmp.gt.s32.totalorder %v882_v12, 0  ;;  %vm428_vm7 = vcmp.lt.s32.totalorder %v2179_v15, 0 }
  0x7b   : > { %v498_v63 = vsub.s32 32, %v497_v60  ;;  %v499_v1 = vshll.u32 %v2304_v0, %v497_v60  ;;  %v502_v53 = vsub.s32 4294967266, %v497_v60  ;;  %v823_v0 = vmul.u32 %v2292_v50, %v807_v55 }
  0x7c   : > { %v405_v58 = vmul.f32 %v404_v17, %v402_v44  ;;  %v884_v26 = vsel %vm883_vm6, %v882_v12, 0  ;;  %v827_v32 = vsel %vm825_vm5, %v826_v25, %v2339_v7  ;;  %v2356_v24 = vand.u32 3, %v411_v56 }
  0x7d   : > { %v500_v8 = vshrl.u32 %v482_v41, %v498_v63  ;;  %v503_v10 = vadd.s32 127, %v502_v53  ;;  %v886_v33 = vand.u32 31, %v884_v26  ;;  %v828_v34 = vadd.s32 %v827_v32, %v823_v0 }
  0x7e   : > { %v406_v5 = vxor.u32 2147483648, %v405_v58  ;;  %v879_v36 = vand.u32 8388607, %v872_v39  ;;  %v2360_v37 = vand.u32 3, %v415_v23  ;;  %v2362_v40 = vshrl.u32 %v884_v26, 5 }
  0x7f   : > { %v501_v22 = vor.u32 %v500_v8, %v499_v1  ;;  %v504_v2 = vshll.u32 %v503_v10, 23  ;;  %v887_v17 = vsub.s32 32, %v886_v33  ;;  %v889_v35 = vshll.u32 %v2060_v43, %v886_v33 }
  0x80   : > { %v407_v20 = vsel %vm324_vm13, %v406_v5, %v405_v58  ;;  %v829_v42 = vadd.s32 536870912, %v828_v34  ;;  %v892_v52 = vshll.u32 %v2061_v45, %v886_v33  ;;  %v895_v54 = vshll.u32 %v2062_v47, %v886_v33 }
  0x81   : > { %v410_v21 = vsel %vm2314_vm1, %v2176_v14, %v407_v20  ;;  %v505_v30 = vor.u32 4788187, %v504_v2  ;;  %v508_v50 = vcvt.s32.f32 %v501_v22  ;;  %v898_v11 = vshll.u32 %v2063_v49, %v886_v33 }
  0x82   : > { %1946 = vcosq.f32 %v410_v21  ;;  %v890_v55 = vshrl.u32 %v2061_v45, %v887_v17  ;;  %v893_v9 = vshrl.u32 %v2062_v47, %v887_v17  ;;  %v901_v18 = vshll.u32 %v2064_v51, %v886_v33 }
  0x83   : > { %1948 = vsinq.f32 %v410_v21  ;;  %v506_v41 = vand.u32 2147483647, %v505_v30  ;;  %v2371_v57 = vshrl.u32 %v829_v42, 30  ;;  %v896_v27 = vshrl.u32 %v2063_v49, %v887_v17 }
  0x84   : > { %1950 = vpow2.f32 %v318_v4  ;;  %v899_v29 = vshrl.u32 %v2064_v51, %v887_v17  ;;  %v902_v58 = vshrl.u32 %v2065_v59, %v887_v17  ;;  %vm414_vm8 = vweird.f32 %v2176_v14 }
  0x85   : > { %v509_v44 = vmul.f32 %v508_v50, %v506_v41  ;;  %vm626_vm9 = vcmp.lt.s32.totalorder %v2356_v24, 2  ;;  %vm627_vm10 = vcmp.eq.s32.totalorder %v2356_v24, 0  ;;  %vm630_vm11 = vcmp.eq.s32.totalorder %v2356_v24, 2 }
  0x86   : > { %v880_v60 = vor.u32 8388608, %v879_v36  ;;  %vm417_vm12 = vcmp.lt.s32.totalorder %v2360_v37, 2  ;;  %vm418_vm13 = vcmp.eq.s32.totalorder %v2360_v37, 0  ;;  %v831_v61 = vshll.u32 %v2371_v57, 30 }
  0x87   : > { %v900_v63 = vor.u32 %v899_v29, %v898_v11  ;;  %vm421_vm14 = vcmp.eq.s32.totalorder %v2360_v37, 2  ;;  %vm2386_vm15 = vcmp.le.f32.partialorder %v426_v19, 0.7853982  ;;  %v510_v53 = vxor.u32 2147483648, %v509_v44 }
  0x88   : > { %v903_v3 = vor.u32 %v902_v58, %v901_v18  ;;  %vm907_vm0 = vcmp.lt.s32.totalorder %v2362_v40, 4  ;;  %v2391_v4 = vsub.s32 %v828_v34, %v831_v61  ;;  %v891_v5 = vor.u32 %v890_v55, %v889_v35  ;;  %v1812_v61 = vld [vmem:[%s2277_s21 + $0x1] ss:$0 sm:$0xff] }
  0x89   : > { %v894_v7 = vor.u32 %v893_v9, %v892_v52  ;;  %v897_v56 = vor.u32 %v896_v27, %v895_v54  ;;  %v824_v8 = vadd.s32 %v2338_v48, %v2333_v62  ;;  %vm904_vm1 = vcmp.lt.s32.totalorder %v2362_v40, 1 }
  0x8a   : > { %vm906_vm2 = vcmp.lt.s32.totalorder %v2362_v40, 3  ;;  %v2397_v19 = vshll.u32 %v880_v60, 8  ;;  %v834_v12 = vsub.s32 0, %v2391_v4  ;;  %v888_v20 = vshrl.u32 %v2060_v43, %v887_v17 }
  0x8b   : > { %vm905_vm3 = vcmp.lt.s32.totalorder %v2362_v40, 2  ;;  %v913_v0 = vsel %vm907_vm0, %v900_v63, 920167782  ;;  %v511_v62 = vsel %vm428_vm7, %v510_v53, %v509_v44  ;;  %v909_v48 = vsel %vm907_vm0, %v897_v56, 2102212464 }
  0x8c   : > { %v917_v2 = vsel %vm907_vm0, %v903_v3, 1326507024  ;;  %v1815_v26 = vmin.u32 %v834_v12, %v2391_v4  ;;  %v912_v30 = vsel %vm904_vm1, %v891_v5, %v894_v7  ;;  %v914_v50 = vsel %vm906_vm2, %v897_v56, %v913_v0  ;;  %v1830_v53 = vld [vmem:[%s2168_s19 + $0x2] ss:$0 sm:$0xff]  ;;  %v1813_v0 = vld [vmem:[%s2277_s21 + $0x5] ss:$0 sm:$0xff] }
  0x8d   : > { %v916_v41 = vsel %vm904_vm1, %v894_v7, %v897_v56  ;;  %v918_v34 = vsel %vm906_vm2, %v900_v63, %v917_v2  ;;  %v908_v42 = vsel %vm904_vm1, %v888_v20, %v891_v5  ;;  %v910_v11 = vsel %vm906_vm2, %v894_v7, %v909_v48 }
  0x8e   : > { %v836_v35 = vclz %v1815_v26  ;;  %v915_v44 = vsel %vm905_vm3, %v912_v30, %v914_v50  ;;  %v919_v37 = vsel %vm905_vm3, %v916_v41, %v918_v34  ;;  %v514_v60 = vsel %vm2386_vm15, %v2179_v15, %v511_v62  ;;  %v1793_v26 = vld [vmem:[%s2277_s21 + $0x4] ss:$0 sm:$0xff] }
  0x8f   : > { %v1947_v10 = vpop.eup %1946  ;;  %v2448_v29 = vmul.u32.u64.low %v2397_v19, %v919_v37  ;;  %v2449_v58 = vmul.u32.u64.high %v2397_v19, %v919_v37, %v2448_v29  ;;  %v2456_v14 = vmul.u32.u64.low %v2397_v19, %v915_v44  ;;  %v2457_v63 = vmul.u32.u64.high %v2397_v19, %v915_v44, %v2456_v14 }
  0x90   : > { %v1949_v21 = vpop.eup %1948  ;;  %v422_v22 = vxor.u32 2147483648, %v1947_v10  ;;  %v1816_v18 = vadd.s32 4294967294, %v836_v35  ;;  %v512_v3 = vsub.s32 4, %v2290_v46  ;;  %v854_v7 = vsub.s32 4, %v2371_v57 }
  0x91   : > { %v1951_v23 = vpop.eup %1950  ;;  %v419_v25 = vxor.u32 2147483648, %v1949_v21  ;;  %v911_v20 = vsel %vm905_vm3, %v908_v42, %v910_v11  ;;  %1952 = vcosq.f32 %v514_v60  ;;  %vm929_vm5 = vc.u32 %v2449_v58, %v2456_v14 }
  0x92   : > { %v423_v32 = vsel %vm421_vm14, %v422_v22, %v1949_v21  ;;  %v632_v33 = vsel %vm630_vm11, %v422_v22, %v1949_v21  ;;  %vm1817_vm4 = vcmp.lt.s32.totalorder %v1816_v18, 0  ;;  %v762_v21 = vmul.f32 %v1812_v61, %v2273_v31 }
  0x93   : > { %v420_v36 = vsel %vm418_vm13, %v1947_v10, %v419_v25  ;;  %v629_v17 = vsel %vm627_vm10, %v1947_v10, %v419_v25  ;;  %v839_v5 = vsel %vm1817_vm4, 0, %v1816_v18  ;;  %v2469_v22 = vmul.f32 %v2173_v13, %v1830_v53 }
  0x94   : > { %v424_v52 = vsel %vm417_vm12, %v420_v36, %v423_v32  ;;  %v633_v54 = vsel %vm626_vm9, %v629_v17, %v632_v33  ;;  %v840_v56 = vsub.s32 32, %v839_v5  ;;  %v841_v10 = vshll.u32 %v2391_v4, %v839_v5 }
  0x95   : > { %v425_v55 = vsel %vm414_vm8, nan, %v424_v52  ;;  %v634_v9 = vsel %vm414_vm8, nan, %v633_v54  ;;  %v844_v12 = vsub.s32 4294967266, %v839_v5  ;;  %v930_v2 = vadd.s32 1, %v2457_v63 }
  0x96   : > { %v2443_v27 = vmul.f32 %v1951_v23, %v425_v55  ;;  %v2445_v24 = vmul.f32 %v1951_v23, %v634_v9  ;;  %v842_v62 = vshrl.u32 %v824_v8, %v840_v56  ;;  %v513_v40 = vsel %vm428_vm7, %v512_v3, %v2290_v46 }
  0x97   : > { %v845_v48 = vadd.s32 127, %v844_v12  ;;  %1954 = vsinq.f32 %v514_v60  ;;  %vm770_vm6 = vcmp.lt.s32.totalorder %v2194_v28, 0  ;;  %v927_v4 = vmul.u32 %v2397_v19, %v911_v20 }
  0x98   : > { %v763_v23 = vmul.f32 %v1813_v0, %v2273_v31  ;;  %v843_v13 = vor.u32 %v842_v62, %v841_v10  ;;  %v855_v8 = vsel %vm770_vm6, %v854_v7, %v2371_v57  ;;  %v764_v30 = vmul.f32 1.442695, %v762_v21 }
  0x99   : > { %v846_v25 = vshll.u32 %v845_v48, 23  ;;  %v931_v50 = vsel %vm929_vm5, %v930_v2, %v2457_v63  ;;  %v1217_v32 = vand.u32 2139095040, %v2469_v22  ;;  %v2488_v46 = vsel %vm2386_vm15, 0, %v513_v40 }
  0x9a   : > { %vm2492_vm7 = vcmp.le.f32.partialorder %v768_v6, 0.7853982  ;;  %v850_v41 = vcvt.s32.f32 %v843_v13  ;;  %v932_v34 = vadd.s32 %v931_v50, %v927_v4  ;;  %v1214_v36 = vand.u32 2147483647, %v2469_v22 }
  0x9b   : > { %v847_v33 = vor.u32 4788187, %v846_v25  ;;  %v857_v57 = vsel %vm2492_vm7, 0, %v855_v8  ;;  %v1218_v17 = vshrl.u32 %v1217_v32, 23  ;;  %v317_v35 = vmul.f32 %v1793_v26, %v2273_v31 }
  0x9c   : > { %v766_v1 = vmul.f32 1.442695, %v763_v23  ;;  %1956 = vpow2.f32 %v764_v30  ;;  %v933_v52 = vadd.s32 536870912, %v932_v34  ;;  %v519_v6 = vadd.s32 3, %v2488_v46 }
  0x9d   : > { %v848_v42 = vand.u32 2147483647, %v847_v33  ;;  %v1834_v54 = vadd.s32 4294967169, %v1218_v17  ;;  %v861_v44 = vadd.s32 3, %v857_v57  ;;  %v1321_v55 = vand.u32 2139095040, %v2182_v16 }
  0x9e   : > { %v934_v9 = vshrl.u32 %v933_v52, 30  ;;  %v1221_v18 = vand.u32 8388607, %v1214_v36  ;;  %v1318_v29 = vand.u32 2147483647, %v2182_v16  ;;  %1958 = vpow2.f32 %v766_v1  ;;  %v2508_v3 = vpop.eup %1952 }
  0x9f   : > { %v851_v11 = vmul.f32 %v850_v41, %v848_v42  ;;  %v1224_v37 = vadd.s32 1, %v1834_v54  ;;  %v2505_v60 = vmul.f32 1.442695, %v317_v35  ;;  %vm874_vm8 = vcmp.lt.s32.totalorder %v2281_v38, 0 }
  0xa0   : > { %v935_v63 = vshll.u32 %v934_v9, 30  ;;  %v1322_v53 = vshrl.u32 %v1321_v55, 23  ;;  %v2510_v5 = vand.u32 3, %v519_v6  ;;  %v2514_v56 = vand.u32 3, %v861_v44 }
  0xa1   : > { %v852_v61 = vxor.u32 2147483648, %v851_v11  ;;  %vm1225_vm9 = vcmp.gt.s32.totalorder %v1224_v37, 0  ;;  %v1222_v0 = vor.u32 8388608, %v1221_v18  ;;  %v2523_v21 = vand.u32 8388607, %v1318_v29 }
  0xa2   : > { %v1226_v10 = vsel %vm1225_vm9, %v1224_v37, 0  ;;  %v2519_v20 = vsub.s32 %v932_v34, %v935_v63  ;;  %v2529_v48 = vadd.s32 %v2456_v14, %v2449_v58  ;;  %v2531_v2 = vand.u32 3, %v857_v57 }
  0xa3   : > { %v853_v7 = vsel %vm770_vm6, %v852_v61, %v851_v11  ;;  %v1228_v40 = vand.u32 31, %v1226_v10  ;;  %v958_v23 = vsub.s32 4, %v934_v9  ;;  %v1838_v13 = vadd.s32 4294967169, %v1322_v53 }
  0xa4   : > { %v856_v12 = vsel %vm2492_vm7, %v2194_v28, %v853_v7  ;;  %v2525_v62 = vpop.eup %1954  ;;  %v938_v4 = vsub.s32 0, %v2519_v20  ;;  %v526_v25 = vxor.u32 2147483648, %v2508_v3  ;;  %vm2540_vm10 = vcmp.le.f32.partialorder %v872_v39, 0.7853982 }
  0xa5   : > { %1960 = vcosq.f32 %v856_v12  ;;  %v1229_v8 = vsub.s32 32, %v1228_v40  ;;  %v1231_v26 = vshll.u32 %v2060_v43, %v1228_v40  ;;  %v1234_v30 = vshll.u32 %v2061_v45, %v1228_v40 }
  0xa6   : > { %1962 = vsinq.f32 %v856_v12  ;;  %v523_v50 = vxor.u32 2147483648, %v2525_v62  ;;  %v1819_v14 = vmin.u32 %v938_v4, %v2519_v20  ;;  %v2545_v32 = vshll.u32 %v1222_v0, 8 }
  0xa7   : > { %v1326_v19 = vor.u32 8388608, %v2523_v21  ;;  %v1227_v33 = vshrl.u32 %v1226_v10, 5  ;;  %v1232_v41 = vshrl.u32 %v2061_v45, %v1229_v8  ;;  %v1235_v57 = vshrl.u32 %v2062_v47, %v1229_v8 }
  0xa8   : > { %v1237_v34 = vshll.u32 %v2062_v47, %v1228_v40  ;;  %vm867_vm11 = vcmp.eq.s32.totalorder %v2514_v56, 2  ;;  %v940_v17 = vclz %v1819_v14  ;;  %v959_v39 = vsel %vm874_vm8, %v958_v23, %v934_v9 }
  0xa9   : > { %vm1076_vm12 = vcmp.eq.s32.totalorder %v2531_v2, 2  ;;  %v1230_v35 = vshrl.u32 %v2060_v43, %v1229_v8  ;;  %v2556_v1 = vadd.s32 1, %v1838_v13  ;;  %v2558_v42 = vpop.eup %1956  ;;  %vm864_vm13 = vcmp.eq.s32.totalorder %v2514_v56, 0 }
  0xaa   : > { %vm1073_vm14 = vcmp.eq.s32.totalorder %v2531_v2, 0  ;;  %v1233_v52 = vor.u32 %v1232_v41, %v1231_v26  ;;  %v1236_v54 = vor.u32 %v1235_v57, %v1234_v30  ;;  %v1238_v6 = vshrl.u32 %v2063_v49, %v1229_v8 }
  0xab   : > { %v1240_v11 = vshll.u32 %v2063_v49, %v1228_v40  ;;  %vm863_vm15 = vcmp.lt.s32.totalorder %v2514_v56, 2  ;;  %v1820_v44 = vadd.s32 4294967294, %v940_v17  ;;  %vm1072_vm0 = vcmp.lt.s32.totalorder %v2531_v2, 2  ;;  %v2570_v61 = vpop.eup %1958 }
  0xac   : > { %v1241_v55 = vshrl.u32 %v2064_v51, %v1229_v8  ;;  %v1243_v9 = vshll.u32 %v2064_v51, %v1228_v40  ;;  %v1244_v18 = vshrl.u32 %v2065_v59, %v1229_v8  ;;  %vm860_vm1 = vweird.f32 %v2194_v28 }
  0xad   : > { %v1239_v37 = vor.u32 %v1238_v6, %v1237_v34  ;;  %vm1246_vm2 = vcmp.lt.s32.totalorder %v1227_v33, 1  ;;  %vm1247_vm3 = vcmp.lt.s32.totalorder %v1227_v33, 2  ;;  %vm1248_vm4 = vcmp.lt.s32.totalorder %v1227_v33, 3 }
  0xae   : > { %vm522_vm5 = vcmp.eq.s32.totalorder %v2510_v5, 0  ;;  %vm525_vm6 = vcmp.eq.s32.totalorder %v2510_v5, 2  ;;  %vm1821_vm7 = vcmp.lt.s32.totalorder %v1820_v44, 0  ;;  %v1242_v63 = vor.u32 %v1241_v55, %v1240_v11 }
  0xaf   : > { %v1245_v53 = vor.u32 %v1244_v18, %v1243_v9  ;;  %vm1249_vm9 = vcmp.lt.s32.totalorder %v1227_v33, 4  ;;  %v943_v7 = vsel %vm1821_vm7, 0, %v1820_v44  ;;  %v1250_v10 = vsel %vm1246_vm2, %v1230_v35, %v1233_v52 }
  0xb0   : > { %v1251_v12 = vsel %vm1249_vm9, %v1239_v37, 2102212464  ;;  %v1254_v0 = vsel %vm1246_vm2, %v1233_v52, %v1236_v54  ;;  %v944_v40 = vsub.s32 32, %v943_v7  ;;  %v945_v4 = vshll.u32 %v2519_v20, %v943_v7 }
  0xb1   : > { %v948_v23 = vsub.s32 4294967266, %v943_v7  ;;  %v1252_v13 = vsel %vm1248_vm4, %v1236_v54, %v1251_v12  ;;  %v2580_v8 = vsel %vm2540_vm10, 0, %v959_v39  ;;  %v1255_v26 = vsel %vm1249_vm9, %v1242_v63, 920167782 }
  0xb2   : > { %v1258_v30 = vsel %vm1246_vm2, %v1236_v54, %v1239_v37  ;;  %v1259_v14 = vsel %vm1249_vm9, %v1245_v53, 1326507024  ;;  %v1961_v41 = vpop.eup %1960  ;;  %v946_v57 = vshrl.u32 %v2529_v48, %v944_v40  ;;  %v1256_v17 = vsel %vm1248_vm4, %v1239_v37, %v1255_v26 }
  0xb3   : > { %v949_v34 = vadd.s32 127, %v948_v23  ;;  %v1260_v35 = vsel %vm1248_vm4, %v1242_v63, %v1259_v14  ;;  %v1963_v20 = vpop.eup %1962  ;;  %v868_v52 = vxor.u32 2147483648, %v1961_v41  ;;  %v1253_v6 = vsel %vm1247_vm3, %v1250_v10, %v1252_v13 }
  0xb4   : > { %v1257_v11 = vsel %vm1247_vm3, %v1254_v0, %v1256_v17  ;;  %v1261_v39 = vsel %vm1247_vm3, %v1258_v30, %v1260_v35  ;;  %v865_v44 = vxor.u32 2147483648, %v1963_v20  ;;  %v947_v55 = vor.u32 %v946_v57, %v945_v4 }
  0xb5   : > { %v950_v54 = vshll.u32 %v949_v34, 23  ;;  %vm1329_vm2 = vcmp.gt.s32.totalorder %v2556_v1, 0  ;;  %v869_v48 = vsel %vm867_vm11, %v868_v52, %v1963_v20  ;;  %v1078_v9 = vsel %vm1076_vm12, %v868_v52, %v1963_v20 }
  0xb6   : > { %v2595_v18 = vmul.u32.u64.low %v2545_v32, %v1261_v39  ;;  %v2596_v37 = vmul.u32.u64.high %v2545_v32, %v1261_v39, %v2595_v18  ;;  %v866_v63 = vsel %vm864_vm13, %v1961_v41, %v865_v44  ;;  %v954_v53 = vcvt.s32.f32 %v947_v55 }
  0xb7   : > { %v951_v33 = vor.u32 4788187, %v950_v54  ;;  %v1075_v7 = vsel %vm1073_vm14, %v1961_v41, %v865_v44  ;;  %v870_v10 = vsel %vm863_vm15, %v866_v63, %v869_v48  ;;  %v1330_v26 = vsel %vm1329_vm2, %v2556_v1, 0 }
  0xb8   : > { %v1079_v12 = vsel %vm1072_vm0, %v1075_v7, %v1078_v9  ;;  %v2607_v0 = vmul.u32.u64.low %v2545_v32, %v1257_v11  ;;  %v2608_v40 = vmul.u32.u64.high %v2545_v32, %v1257_v11, %v2607_v0  ;;  %v871_v4 = vsel %vm860_vm1, nan, %v870_v10 }
  0xb9   : > { %v952_v23 = vand.u32 2147483647, %v951_v33  ;;  %v1080_v13 = vsel %vm860_vm1, nan, %v1079_v12  ;;  %v524_v56 = vsel %vm522_vm5, %v2508_v3, %v523_v50  ;;  %v527_v2 = vsel %vm525_vm6, %v526_v25, %v2525_v62 }
  0xba   : > { %v2627_v30 = vadd.s32 3, %v2580_v8  ;;  %v2630_v28 = vmul.f32 %v2558_v42, %v1080_v13  ;;  %v1269_v1 = vmul.u32 %v2545_v32, %v1253_v6  ;;  %vm1271_vm11 = vc.u32 %v2596_v37, %v2607_v0 }
  0xbb   : > { %v955_v14 = vmul.f32 %v954_v53, %v952_v23  ;;  %v1332_v41 = vand.u32 31, %v1330_v26  ;;  %v976_v57 = vmul.f32 %v2558_v42, %v871_v4  ;;  %v1272_v34 = vadd.s32 1, %v2608_v40 }
  0xbc   : > { %v1331_v17 = vshrl.u32 %v1330_v26, 5  ;;  %v2639_v35 = vshll.u32 %v1326_v19, 8  ;;  %vm521_vm12 = vcmp.lt.s32.totalorder %v2510_v5, 2  ;;  %vm1650_vm15 = vcmask 1043456  }
  0xbd   : > { %v956_v20 = vxor.u32 2147483648, %v955_v14  ;;  %v1333_v52 = vsub.s32 32, %v1332_v41  ;;  %v1335_v11 = vshll.u32 %v2060_v43, %v1332_v41  ;;  %v1338_v32 = vshll.u32 %v2061_v45, %v1332_v41 }
  0xbe   : > { %v1273_v6 = vsel %vm1271_vm11, %v1272_v34, %v2608_v40  ;;  %v1341_v39 = vshll.u32 %v2062_v47, %v1332_v41  ;;  %v1344_v42 = vshll.u32 %v2063_v49, %v1332_v41  ;;  %v1347_v44 = vshll.u32 %v2064_v51, %v1332_v41 }
  0xbf   : > { %v957_v21 = vsel %vm874_vm8, %v956_v20, %v955_v14  ;;  %v1274_v19 = vadd.s32 %v1273_v6, %v1269_v1  ;;  %v1334_v55 = vshrl.u32 %v2060_v43, %v1333_v52  ;;  %v1336_v54 = vshrl.u32 %v2061_v45, %v1333_v52 }
  0xc0   : > { %v960_v48 = vsel %vm2540_vm10, %v2281_v38, %v957_v21  ;;  %v1339_v9 = vshrl.u32 %v2062_v47, %v1333_v52  ;;  %v1342_v18 = vshrl.u32 %v2063_v49, %v1333_v52  ;;  %v1345_v63 = vshrl.u32 %v2064_v51, %v1333_v52 }
  0xc1   : > { %1964 = vcosq.f32 %v960_v48  ;;  %v1275_v33 = vadd.s32 536870912, %v1274_v19  ;;  %v1337_v53 = vor.u32 %v1336_v54, %v1335_v11  ;;  %v1348_v7 = vshrl.u32 %v2065_v59, %v1333_v52 }
  0xc2   : > { %1966 = vsinq.f32 %v960_v48  ;;  %v1340_v43 = vor.u32 %v1339_v9, %v1338_v32  ;;  %v1343_v10 = vor.u32 %v1342_v18, %v1341_v39  ;;  %v1346_v45 = vor.u32 %v1345_v63, %v1344_v42 }
  0xc3   : > { %v2659_v12 = vshrl.u32 %v1275_v33, 30  ;;  %v1349_v58 = vor.u32 %v1348_v7, %v1347_v44  ;;  %vm1350_vm8 = vcmp.lt.s32.totalorder %v1331_v17, 1  ;;  %v1634_v40 = vrot.slane %v976_v57, 4 }
  0xc4   : > { %vm1351_vm10 = vcmp.lt.s32.totalorder %v1331_v17, 2  ;;  %vm1352_vm13 = vcmp.lt.s32.totalorder %v1331_v17, 3  ;;  %vm1353_vm14 = vcmp.lt.s32.totalorder %v1331_v17, 4  ;;  %v1358_v47 = vsel %vm1350_vm8, %v1337_v53, %v1340_v43 }
  0xc5   : > { %v1277_v49 = vshll.u32 %v2659_v12, 30  ;;  %v1354_v51 = vsel %vm1350_vm8, %v1334_v55, %v1337_v53  ;;  %v1355_v4 = vsel %vm1353_vm14, %v1343_v10, 2102212464  ;;  %v1359_v23 = vsel %vm1353_vm14, %v1346_v45, 920167782 }
  0xc6   : > { %v1356_v59 = vsel %vm1352_vm13, %v1340_v43, %v1355_v4  ;;  %v1360_v13 = vsel %vm1352_vm13, %v1343_v10, %v1359_v23  ;;  %v1362_v26 = vsel %vm1350_vm8, %v1340_v43, %v1343_v10  ;;  %v1363_v14 = vsel %vm1353_vm14, %v1349_v58, 1326507024 }
  0xc7   : > { %1968 = vpow2.f32 %v2505_v60  ;;  %v1278_v1 = vsub.s32 %v1274_v19, %v1277_v49  ;;  %v1361_v41 = vsel %vm1351_vm10, %v1358_v47, %v1360_v13  ;;  %v528_v57 = vsel %vm521_vm12, %v524_v56, %v527_v2 }
  0xc8   : > { %v1364_v34 = vsel %vm1352_vm13, %v1346_v45, %v1363_v14  ;;  %v2671_v20 = vmul.u32.u64.low %v2639_v35, %v1361_v41  ;;  %v2672_v52 = vmul.u32.u64.high %v2639_v35, %v1361_v41, %v2671_v20  ;;  %v1174_v11 = vand.u32 3, %v2580_v8 }
  0xc9   : > { %v1280_v32 = vsub.s32 0, %v1278_v1  ;;  %v1357_v6 = vsel %vm1351_vm10, %v1354_v51, %v1356_v59  ;;  %v1365_v60 = vsel %vm1351_vm10, %v1362_v26, %v1364_v34  ;;  %v966_v39 = vand.u32 3, %v2627_v30 }
  0xca   : > { %v2680_v42 = vmul.u32.u64.low %v2639_v35, %v1365_v60  ;;  %v2681_v5 = vmul.u32.u64.high %v2639_v35, %v1365_v60, %v2680_v42  ;;  %v1651_v56 = vsel %vm1650_vm15, %v2443_v27, %v1634_v40  ;;  %vm518_vm0 = vweird.f32 %v2179_v15 }
  0xcb   : > { %v1835_v2 = vmin.u32 %v1280_v32, %v1278_v1  ;;  %1657 = vst [vmem:[%s2685_s25] sm:$0xff] %v1651_v56  ;;  %v1373_v8 = vmul.u32 %v2639_v35, %v1357_v6  ;;  %v1376_v17 = vadd.s32 1, %v2672_v52  ;;  %v529_v30 = vsel %vm518_vm0, nan, %v528_v57  ;;  %v1832_v6 = vld [vmem:[%s2277_s21 + $0x2] ss:$0 sm:$0xff] }
  0xcc   : > { %vm964_vm1 = vweird.f32 %v2281_v38  ;;  %vm971_vm3 = vcmp.eq.s32.totalorder %v966_v39, 2  ;;  %vm1176_vm4 = vcmp.eq.s32.totalorder %v1174_v11, 0  ;;  %vm1179_vm5 = vcmp.eq.s32.totalorder %v1174_v11, 2 }
  0xcd   : > { %v1282_v44 = vclz %v1835_v2  ;;  %vm1375_vm6 = vc.u32 %v2681_v5, %v2671_v20  ;;  %vm968_vm7 = vcmp.eq.s32.totalorder %v966_v39, 0  ;;  %vm967_vm9 = vcmp.lt.s32.totalorder %v966_v39, 2 }
  0xce   : > { %v1965_v21 = vpop.eup %1964  ;;  %v1377_v35 = vsel %vm1375_vm6, %v1376_v17, %v2672_v52  ;;  %vm1175_vm2 = vcmp.lt.s32.totalorder %v1174_v11, 2  ;;  %v1270_v63 = vadd.s32 %v2607_v0, %v2596_v37  ;;  %v1208_v56 = vmul.f32 %v1832_v6, %v2273_v31 }
  0xcf   : > { %v1967_v27 = vpop.eup %1966  ;;  %v972_v19 = vxor.u32 2147483648, %v1965_v21  ;;  %v1836_v55 = vadd.s32 4294967294, %v1282_v44  ;;  %v1378_v48 = vadd.s32 %v1377_v35, %v1373_v8  ;;  %vm1216_vm12 = vcmp.lt.s32.totalorder %v2469_v22, 0 }
  0xd0   : > { %v969_v54 = vxor.u32 2147483648, %v1967_v27  ;;  %v1300_v2 = vsub.s32 4, %v2659_v12  ;;  %vm1215_vm8 = vcmp.le.f32.partialorder %v1214_v36, 0.7853982  ;;  %v1374_v44 = vadd.s32 %v2671_v20, %v2681_v5  ;;  %v1833_v5 = vld [vmem:[%s2277_s21 + $0x6] ss:$0 sm:$0xff] }
  0xd1   : > { %v973_v9 = vsel %vm971_vm3, %v972_v19, %v1967_v27  ;;  %v1181_v18 = vsel %vm1179_vm5, %v972_v19, %v1967_v27  ;;  %vm1837_vm11 = vcmp.lt.s32.totalorder %v1836_v55, 0  ;;  %v1379_v43 = vadd.s32 536870912, %v1378_v48 }
  0xd2   : > { %v970_v33 = vsel %vm968_vm7, %v1965_v21, %v969_v54  ;;  %v1178_v53 = vsel %vm1176_vm4, %v1965_v21, %v969_v54  ;;  %v1285_v7 = vsel %vm1837_vm11, 0, %v1836_v55  ;;  %v1210_v21 = vmul.f32 1.442695, %v1208_v56 }
  0xd3   : > { %v974_v10 = vsel %vm967_vm9, %v970_v33, %v973_v9  ;;  %v1182_v45 = vsel %vm1175_vm2, %v1178_v53, %v1181_v18  ;;  %v1286_v58 = vsub.s32 32, %v1285_v7  ;;  %v1287_v40 = vshll.u32 %v1278_v1, %v1285_v7 }
  0xd4   : > { %v2700_v47 = vpop.eup %1968  ;;  %v975_v49 = vsel %vm964_vm1, nan, %v974_v10  ;;  %v1183_v51 = vsel %vm964_vm1, nan, %v1182_v45  ;;  %v1290_v4 = vsub.s32 4294967266, %v1285_v7  ;;  %v2706_v37 = vshrl.u32 %v1379_v43, 30 }
  0xd5   : > { %v531_v0 = vmul.f32 %v2700_v47, %v529_v30  ;;  %v977_v23 = vmul.f32 %v2570_v61, %v975_v49  ;;  %v2711_v59 = vmul.f32 %v2570_v61, %v1183_v51  ;;  %v1288_v13 = vshrl.u32 %v1270_v63, %v1286_v58 }
  0xd6   : > { %v1291_v26 = vadd.s32 127, %v1290_v4  ;;  %v1381_v14 = vshll.u32 %v2706_v37, 30  ;;  %v1301_v27 = vsel %vm1216_vm12, %v1300_v2, %v2659_v12  ;;  %v728_v12 = vand.u32 3, %v2488_v46 }
  0xd7   : > { %v1289_v1 = vor.u32 %v1288_v13, %v1287_v40  ;;  %v1635_v41 = vrot.slane %v977_v23, 4  ;;  %v1303_v36 = vsel %vm1215_vm8, 0, %v1301_v27  ;;  %v1209_v10 = vmul.f32 %v1833_v5, %v2273_v31 }
  0xd8   : > { %v1292_v38 = vshll.u32 %v1291_v26, 23  ;;  %v1382_v57 = vsub.s32 %v1378_v48, %v1381_v14  ;;  %v1307_v20 = vadd.s32 3, %v1303_v36  ;;  %v1517_v58 = vand.u32 3, %v1303_v36 }
  0xd9   : > { %v1652_v34 = vsel %vm1650_vm15, %v531_v0, %v1635_v41  ;;  %v1296_v11 = vcvt.s32.f32 %v1289_v1  ;;  %vm1320_vm13 = vcmp.lt.s32.totalorder %v2182_v16, 0  ;;  %v1404_v49 = vsub.s32 4, %v2706_v37 }
  0xda   : > { %v1293_v52 = vor.u32 4788187, %v1292_v38  ;;  %v1384_v32 = vsub.s32 0, %v1382_v57  ;;  %1660 = vst [vmem:[%s2685_s25 + $0x18] sm:$0xff] %v1652_v34  ;;  %v1308_v45 = vand.u32 3, %v1307_v20  ;;  %vm730_vm14 = vcmp.eq.s32.totalorder %v728_v12, 0 }
  0xdb   : > { %vm2733_vm1 = vcmp.le.f32.partialorder %v1318_v29, 0.7853982  ;;  %v1212_v46 = vmul.f32 1.442695, %v1209_v10  ;;  %vm1518_vm4 = vcmp.lt.s32.totalorder %v1517_v58, 2  ;;  %vm1522_vm5 = vcmp.eq.s32.totalorder %v1517_v58, 2 }
  0xdc   : > { %v1294_v60 = vand.u32 2147483647, %v1293_v52  ;;  %v1839_v39 = vmin.u32 %v1384_v32, %v1382_v57  ;;  %vm1313_vm3 = vcmp.eq.s32.totalorder %v1308_v45, 2  ;;  %vm1310_vm6 = vcmp.eq.s32.totalorder %v1308_v45, 0 }
  0xdd   : > { %vm1519_vm7 = vcmp.eq.s32.totalorder %v1517_v58, 0  ;;  %vm1309_vm9 = vcmp.lt.s32.totalorder %v1308_v45, 2  ;;  %v1405_v29 = vsel %vm1320_vm13, %v1404_v49, %v2706_v37  ;;  %vm1306_vm2 = vweird.f32 %v2469_v22 }
  0xde   : > { %v1297_v42 = vmul.f32 %v1296_v11, %v1294_v60  ;;  %v1386_v61 = vclz %v1839_v39  ;;  %vm733_vm11 = vcmp.eq.s32.totalorder %v728_v12, 2  ;;  %v1407_v11 = vsel %vm2733_vm1, 0, %v1405_v29 }
  0xdf   : > { %v1640_v32 = vrot.slane %v2445_v24, 4  ;;  %v1411_v56 = vadd.s32 3, %v1407_v11 }
  0xe0   : > { %v1298_v8 = vxor.u32 2147483648, %v1297_v42  ;;  %v1840_v17 = vadd.s32 4294967294, %v1386_v61  ;;  %v735_v61 = vsel %vm733_vm11, %v526_v25, %v2525_v62 }
  0xe2   : > { %v1299_v30 = vsel %vm1216_vm12, %v1298_v8, %v1297_v42  ;;  %vm1841_vm10 = vcmp.lt.s32.totalorder %v1840_v17, 0  ;;  %vm729_vm12 = vcmp.lt.s32.totalorder %v728_v12, 2  ;;  %v732_v42 = vsel %vm730_vm14, %v2508_v3, %v523_v50 }
  0xe3   : > { %v1302_v19 = vsel %vm1215_vm8, %v2469_v22, %v1299_v30  ;;  %v1389_v55 = vsel %vm1841_vm10, 0, %v1840_v17  ;;  %v736_v8 = vsel %vm729_vm12, %v732_v42, %v735_v61  ;;  %v1412_v30 = vand.u32 3, %v1411_v56 }
  0xe4   : > { %1970 = vcosq.f32 %v1302_v19  ;;  %v1390_v35 = vsub.s32 32, %v1389_v55  ;;  %v1391_v54 = vshll.u32 %v1382_v57, %v1389_v55  ;;  %v1394_v48 = vsub.s32 4294967266, %v1389_v55 }
  0xe5   : > { %1972 = vsinq.f32 %v1302_v19  ;;  %vm1417_vm8 = vcmp.eq.s32.totalorder %v1412_v30, 2 }
  0xe6   : > { %v1392_v9 = vshrl.u32 %v1374_v44, %v1390_v35  ;;  %v1395_v18 = vadd.s32 127, %v1394_v48  ;;  %1974 = vpow2.f32 %v1210_v21  ;;  %v1620_v44 = vand.u32 3, %v1407_v11 }
  0xe7   : > { %v737_v21 = vsel %vm518_vm0, nan, %v736_v8 }
  0xe8   : > { %v1393_v63 = vor.u32 %v1392_v9, %v1391_v54  ;;  %v1396_v33 = vshll.u32 %v1395_v18, 23  ;;  %vm1625_vm10 = vcmp.eq.s32.totalorder %v1620_v44, 2  ;;  %v739_v62 = vmul.f32 %v2700_v47, %v737_v21 }
  0xe9   : > { %vm1622_vm14 = vcmp.eq.s32.totalorder %v1620_v44, 0 }
  0xea   : > { %v1397_v53 = vor.u32 4788187, %v1396_v33  ;;  %v1400_v7 = vcvt.s32.f32 %v1393_v63  ;;  %v1641_v48 = vrot.slane %v739_v62, 4 }
  0xec   : > { %v1398_v43 = vand.u32 2147483647, %v1397_v53 }
  0xee   : > { %v1401_v40 = vmul.f32 %v1400_v7, %v1398_v43 }
  0xf0   : > { %v1402_v4 = vxor.u32 2147483648, %v1401_v40 }
  0xf1   : > { %v1971_v0 = vpop.eup %1970 }
  0xf2   : > { %v1973_v31 = vpop.eup %1972  ;;  %v1314_v23 = vxor.u32 2147483648, %v1971_v0  ;;  %v1403_v13 = vsel %vm1320_vm13, %v1402_v4, %v1401_v40  ;;  %vm1414_vm13 = vcmp.eq.s32.totalorder %v1412_v30, 0 }
  0xf3   : > { %v1311_v26 = vxor.u32 2147483648, %v1973_v31  ;;  %v1406_v14 = vsel %vm2733_vm1, %v2182_v16, %v1403_v13  ;;  %v1975_v38 = vpop.eup %1974  ;;  %vm1413_vm1 = vcmp.lt.s32.totalorder %v1412_v30, 2 }
  0xf4   : > { %v1315_v1 = vsel %vm1313_vm3, %v1314_v23, %v1973_v31  ;;  %1976 = vcosq.f32 %v1406_v14  ;;  %v1524_v41 = vsel %vm1522_vm5, %v1314_v23, %v1973_v31  ;;  %vm1621_vm3 = vcmp.lt.s32.totalorder %v1620_v44, 2 }
  0xf5   : > { %v1312_v57 = vsel %vm1310_vm6, %v1971_v0, %v1311_v26  ;;  %1978 = vsinq.f32 %v1406_v14  ;;  %v1521_v34 = vsel %vm1519_vm7, %v1971_v0, %v1311_v26 }
  0xf6   : > { %v1316_v52 = vsel %vm1309_vm9, %v1312_v57, %v1315_v1  ;;  %v1525_v37 = vsel %vm1518_vm4, %v1521_v34, %v1524_v41  ;;  %1980 = vpow2.f32 %v1212_v46  ;;  %vm1410_vm4 = vweird.f32 %v2182_v16 }
  0xf7   : > { %v1317_v6 = vsel %vm1306_vm2, nan, %v1316_v52  ;;  %v1526_v22 = vsel %vm1306_vm2, nan, %v1525_v37 }
  0xf8   : > { %v1422_v60 = vmul.f32 %v1975_v38, %v1317_v6  ;;  %v1630_v39 = vmul.f32 %v1975_v38, %v1526_v22 }
  0xfa   : > { %v1646_v2 = vrot.slane %v1630_v39, 4  ;;  %v1653_v24 = vsel %vm1650_vm15, %v1422_v60, %v1640_v32 }
  0xfb   : > { %1658 = vst [vmem:[%s2685_s25 + $0x8] sm:$0xff] %v1653_v24 }
  0xfc   : > { %v1655_v17 = vsel %vm1650_vm15, %v2630_v28, %v1646_v2 }
  0xfd   : > { %1659 = vst [vmem:[%s2685_s25 + $0x10] sm:$0xff] %v1655_v17 }
 0x101   : > { %v1977_v50 = vpop.eup %1976 }
 0x102   : > { %v1979_v3 = vpop.eup %1978  ;;  %v1418_v25 = vxor.u32 2147483648, %v1977_v50 }
 0x103   : > { %v1415_v27 = vxor.u32 2147483648, %v1979_v3  ;;  %v1981_v15 = vpop.eup %1980 }
 0x104   : > { %v1419_v28 = vsel %vm1417_vm8, %v1418_v25, %v1979_v3  ;;  %v1627_v19 = vsel %vm1625_vm10, %v1418_v25, %v1979_v3 }
 0x105   : > { %v1416_v55 = vsel %vm1414_vm13, %v1977_v50, %v1415_v27  ;;  %v1624_v35 = vsel %vm1622_vm14, %v1977_v50, %v1415_v27 }
 0x106   : > { %v1420_v54 = vsel %vm1413_vm1, %v1416_v55, %v1419_v28  ;;  %v1628_v47 = vsel %vm1621_vm3, %v1624_v35, %v1627_v19 }
 0x107   : > { %v1421_v36 = vsel %vm1410_vm4, nan, %v1420_v54  ;;  %v1629_v9 = vsel %vm1410_vm4, nan, %v1628_v47 }
 0x108   : > { %v1423_v18 = vmul.f32 %v1981_v15, %v1421_v36  ;;  %v1631_v63 = vmul.f32 %v1981_v15, %v1629_v9 }
 0x10a   : > { %v1647_v16 = vrot.slane %v1631_v63, 4  ;;  %v1654_v33 = vsel %vm1650_vm15, %v1423_v18, %v1641_v48 }
 0x10b   : > { %1661 = vst [vmem:[%s2685_s25 + $0x20] sm:$0xff] %v1654_v33 }
 0x10c   : > { %v1656_v20 = vsel %vm1650_vm15, %v2711_v59, %v1647_v16 }
 0x10d   : > { %1662 = vst [vmem:[%s2685_s25 + $0x28] sm:$0xff] %v1656_v20 }
 0x10e   : > { %1995 = shalt.err (!%p1992_p7)
}
 0x10f   : > { %s1996_s7 = scalar_lea.hbm %s2771_s30, 768  ;;  %s2000_s18 = scalar_lea.hbm %s2828_s2, 1536 }
 0x110   : > { %p1997_p8 = scmp.ne.s32.totalorder %s2771_s30, %s1996_s7  ;;  %p2001_p13 = scmp.lt.s32.totalorder %s2771_s30, %s2828_s2 }
 0x111   : > { %p2002_p0 = scmp.lt.s32.totalorder %s2000_s18, %s1996_s7 }
 0x112   : > { %p1998_p11 = pnand %p1997_p8, %p2128_p5 }
 0x113   : > { %p2003_p1 = por %p2002_p0, %p2001_p13 }
 0x114   : > { %p1999_p12 = pneg %p1998_p11 }
 0x116   : > { %p2004_p2 = pnand %p2003_p1, %p1999_p12 }
 0x118   : > { %2007 = shalt.err (!%p2004_p2)
}
 0x119   : > { %s2067_s24 = smov 128   ;;  %s2068_s25 = smov 256  }
 0x11a   : > { %s2069_s26 = smov 8  }
 0x11b   : > { %1878 = dma.vmem_to_hbm [thread:$0]  (%p2128_p5), %s2774_s27, 768, %s2771_s30, %s1664_s12, %s2067_s24, %s2068_s25, %s2069_s26  }
 0x11c PF: > { %s1694_s28 = sand.u32 1, %s2038_s9   ;;  %p1881_p3 = pnand %p1782_p10, %p2139_p9 }
 0x11d   : > { %s1695_s29 = scalar_lea.sflag [#allocation5], %s1694_s28 }
 0x11e   : > { %p1882_p4 = pneg %p1881_p3 }
 0x120   : > { %2033 = dma.done.wait (%p1882_p4), %s1695_s29, 768  }
 0x121   : > { %2035 = vsyncadd (%p1882_p4), %s1695_s29, 4294966528  ;;  %s15_s14 = sadd.s32 1, %s2058_s14   ;;  %s2842_s9 = smov %s2042_s10 }
 0x122   : > { %p12_p6 = scmp.ge.s32.totalorder %s15_s14, 4   ;;  %s2843_s10 = smov %s2046_s11 }
 0x123   : > { %s2844_s11 = smov %s2137_s22  ;;  %s2845_s12 = smov %s2054_s13 }
 0x124   : > { %s2846_s13 = smov %s2848_s17  ;;  %14 = sbr.rel (!%p12_p6) target bundleno = 4 (0x4), region = 158 }
 0x129   :  { %1700 = vsyncpa [#allocation5], 1 }
 0x12a   :  { %1702 = vsyncpa [#allocation5 + $0x1], 1 }

</bundles_post_ra>
